<compile_context>
chip_gen: v7x
topology: tpu7x:2x2x1
jax: 0.10.0
libtpu: 0.0.40
codegen_flags: <defaults>
</compile_context>

<pallas_src>
import jax
import jax.numpy as jnp
from jax.experimental import pallas as pl
from jax.experimental.pallas import tpu as pltpu


def _round_up(x: int, m: int) -> int:
    return ((x + m - 1) // m) * m


def gmf_kernel(u_ref, i_ref, w_ref, b_ref, o_ref):
    """One lane-dense batch block.

    u_ref, i_ref : (D, TB)  gathered user / item embeddings (batch along lanes)
    w_ref        : (D, 1)   affine weight column (resident across the grid)
    b_ref        : (1, 1)   affine bias, SMEM scalar
    o_ref        : (1, TB)  ratings for this batch block (lane-dense output)
    """
    # GMF interaction + affine weighting: pure VPU elementwise work.
    prod = u_ref[...] * i_ref[...] * w_ref[...]                  # (D, TB)
    # Reduce over the latent dim (sublanes) -> lane-major (1, TB) logits row.
    logit = jnp.sum(prod, axis=0, keepdims=True) + b_ref[0, 0]   # (1, TB)
    # Logistic.
    o_ref[...] = 1.0 / (1.0 + jnp.exp(-logit))


def gmf_forward(user_indices, item_indices, user_table, item_table, w, b):
    """user/item_indices: (B,) int32; tables: (N, D) f32; w: (1, D); b: (1, 1).

    Returns (B, 1) float32 ratings, matching GMF.forward.
    """
    B = user_indices.shape[0]
    D = user_table.shape[1]

    # Batch block size: lane-dense (multiple of 128), up to 1024 rows per step.
    TB = min(1024, _round_up(B, 128))
    B_pad = _round_up(B, TB)
    G = B_pad // TB

    pad = B_pad - B
    u_idx = jnp.pad(user_indices, (0, pad))        # pad with index 0 (valid row)
    i_idx = jnp.pad(item_indices, (0, pad))

    # Dense embedding gather in XLA; lay the batch along lanes for the kernel.
    u_t = jnp.take(user_table, u_idx, axis=0).T.astype(jnp.float32)   # (D, B_pad)
    i_t = jnp.take(item_table, i_idx, axis=0).T.astype(jnp.float32)   # (D, B_pad)
    w_col = w.reshape(D, 1).astype(jnp.float32)                       # (D, 1)
    b_s = b.reshape(1, 1).astype(jnp.float32)                         # (1, 1) -> SMEM

    out_row = pl.pallas_call(
        gmf_kernel,
        out_shape=jax.ShapeDtypeStruct((1, B_pad), jnp.float32),
        grid=(G,),
        in_specs=[
            # gathered embeddings: one (D, TB) lane-dense slab per grid step
            pl.BlockSpec((D, TB), lambda i: (0, i)),
            pl.BlockSpec((D, TB), lambda i: (0, i)),
            # affine weight: resident (D, 1) VMEM block across the whole grid
            pl.BlockSpec((D, 1), lambda i: (0, 0)),
            # affine bias: scalar in SMEM (no padded (8,128) VMEM tile)
            pl.BlockSpec(memory_space=pltpu.MemorySpace.SMEM),
        ],
        # lane-dense output row: (1, TB) blocks of a (1, B_pad) slab
        out_specs=pl.BlockSpec((1, TB), lambda i: (0, i)),
        compiler_params=pltpu.CompilerParams(
            # independent batch blocks -> shardable across v7x's 2 TensorCores
            dimension_semantics=("parallel",),
        ),
    )(u_t, i_t, w_col, b_s)

    # Layout plumbing back to the module's (B, 1) output.
    return out_row[0, :B].reshape(B, 1)


def gmf_reference(user_indices, item_indices, user_table, item_table, w, b):
    u = user_table[user_indices]          # (B, D)
    it = item_table[item_indices]         # (B, D)
    prod = u * it
    logits = prod @ w.T + b               # (B, 1)
    return jax.nn.sigmoid(logits)


if __name__ == "__main__":
    # config: small synthetic GMF
    num_users, num_items, latent_dim, batch = 10, 12, 32, 8

    key = jax.random.PRNGKey(0)
    k_u, k_i, k_w, k_b, k_ui, k_ii = jax.random.split(key, 6)

    # Deterministic parameter init (nn.Embedding ~ N(0,1); Linear ~ small uniform)
    user_table = jax.random.normal(k_u, (num_users, latent_dim), dtype=jnp.float32)
    item_table = jax.random.normal(k_i, (num_items, latent_dim), dtype=jnp.float32)
    lim = 1.0 / jnp.sqrt(latent_dim)
    w = jax.random.uniform(k_w, (1, latent_dim), minval=-lim, maxval=lim,
                           dtype=jnp.float32)
    b = jax.random.uniform(k_b, (1, 1), minval=-lim, maxval=lim, dtype=jnp.float32)

    user_indices = jax.random.randint(k_ui, (batch,), 0, num_users, dtype=jnp.int32)
    item_indices = jax.random.randint(k_ii, (batch,), 0, num_items, dtype=jnp.int32)

    rating = gmf_forward(user_indices, item_indices, user_table, item_table, w, b)
    rating = jax.block_until_ready(rating)

    ref = gmf_reference(user_indices, item_indices, user_table, item_table, w, b)
    assert rating.shape == (batch, 1)
    assert jnp.allclose(rating, ref, atol=1e-5, rtol=1e-5), (rating, ref)

    print("KERNEL_OK")
</pallas_src>

<mosaic_0001>
module attributes {stable_mosaic.version = 11 : i64} {
  func.func @gmf_kernel(%arg0: i32, %arg1: memref<32x128xf32, #tpu.memory_space<vmem>>, %arg2: memref<32x128xf32, #tpu.memory_space<vmem>>, %arg3: memref<32x1xf32, #tpu.memory_space<vmem>>, %arg4: memref<1x1xf32, #tpu.memory_space<smem>>, %arg5: memref<1x128xf32, #tpu.memory_space<vmem>>) attributes {dimension_semantics = [#tpu.dimension_semantics<parallel>], iteration_bounds = array<i64: 1>, scalar_prefetch = 0 : i64, scratch_operands = 0 : i64, tpu.core_type = #tpu.core_type<tc>, window_params = [{transform_indices = @transform_0, window_bounds = array<i64: 32, 128>}, {transform_indices = @transform_1, window_bounds = array<i64: 32, 128>}, {pipeline_mode = #tpu.pipeline_mode<synchronous>, transform_indices = @transform_2, window_bounds = array<i64: 32, 1>}, {transform_indices = @transform_3, window_bounds = array<i64: 1, 1>}, {transform_indices = @transform_4, window_bounds = array<i64: 1, 128>}]} {
    %c0 = arith.constant 0 : index
    %c0_0 = arith.constant 0 : index
    %0 = vector.load %arg1[%c0, %c0_0] : memref<32x128xf32, #tpu.memory_space<vmem>>, vector<32x128xf32>
    %c0_1 = arith.constant 0 : index
    %c0_2 = arith.constant 0 : index
    %1 = vector.load %arg2[%c0_1, %c0_2] : memref<32x128xf32, #tpu.memory_space<vmem>>, vector<32x128xf32>
    %2 = arith.mulf %0, %1 : vector<32x128xf32>
    %c0_3 = arith.constant 0 : index
    %c0_4 = arith.constant 0 : index
    %3 = vector.load %arg3[%c0_3, %c0_4] : memref<32x1xf32, #tpu.memory_space<vmem>>, vector<32x1xf32>
    %4 = vector.broadcast %3 : vector<32x1xf32> to vector<32x128xf32>
    %5 = arith.mulf %2, %4 : vector<32x128xf32>
    %cst = arith.constant dense<0.000000e+00> : vector<128xf32>
    %6 = vector.multi_reduction <add>, %5, %cst [0] : vector<32x128xf32> to vector<128xf32>
    %7 = vector.shape_cast %6 : vector<128xf32> to vector<1x128xf32>
    %c0_5 = arith.constant 0 : index
    %c0_6 = arith.constant 0 : index
    %8 = memref.load %arg4[%c0_5, %c0_6] : memref<1x1xf32, #tpu.memory_space<smem>>
    %9 = vector.broadcast %8 : f32 to vector<1x128xf32>
    %10 = arith.addf %7, %9 : vector<1x128xf32>
    %cst_7 = arith.constant 0.000000e+00 : f32
    %11 = vector.broadcast %cst_7 : f32 to vector<1x128xf32>
    %12 = arith.subf %11, %10 : vector<1x128xf32>
    %13 = math.exp %12 : vector<1x128xf32>
    %cst_8 = arith.constant 1.000000e+00 : f32
    %14 = vector.broadcast %cst_8 : f32 to vector<1x128xf32>
    %15 = arith.addf %14, %13 : vector<1x128xf32>
    %cst_9 = arith.constant 1.000000e+00 : f32
    %16 = vector.broadcast %cst_9 : f32 to vector<1x128xf32>
    %17 = arith.divf %16, %15 : vector<1x128xf32>
    %c0_10 = arith.constant 0 : index
    %c0_11 = arith.constant 0 : index
    %18 = vector.load %arg5[%c0_10, %c0_11] : memref<1x128xf32, #tpu.memory_space<vmem>>, vector<1x128xf32>
    tpu.vector_store %arg5[%c0_10, %c0_11], %17 {strides = array<i32>} : memref<1x128xf32, #tpu.memory_space<vmem>>, vector<1x128xf32>,
    return
  }
  func.func @transform_0(%arg0: i32) -> (i32, i32) {
    %c0_i32 = arith.constant 0 : i32
    %c0_i32_0 = arith.constant 0 : i32
    return %c0_i32, %arg0 : i32, i32
  }
  func.func @transform_1(%arg0: i32) -> (i32, i32) {
    %c0_i32 = arith.constant 0 : i32
    %c0_i32_0 = arith.constant 0 : i32
    return %c0_i32, %arg0 : i32, i32
  }
  func.func @transform_2(%arg0: i32) -> (i32, i32) {
    %c0_i32 = arith.constant 0 : i32
    %c0_i32_0 = arith.constant 0 : i32
    %c0_i32_1 = arith.constant 0 : i32
    return %c0_i32, %c0_i32_0 : i32, i32
  }
  func.func @transform_3(%arg0: i32) -> (i32, i32) {
    %c0_i32 = arith.constant 0 : i32
    %c0_i32_0 = arith.constant 0 : i32
    %c0_i32_1 = arith.constant 0 : i32
    return %c0_i32, %c0_i32_0 : i32, i32
  }
  func.func @transform_4(%arg0: i32) -> (i32, i32) {
    %c0_i32 = arith.constant 0 : i32
    %c0_i32_0 = arith.constant 0 : i32
    return %c0_i32, %arg0 : i32, i32
  }
}

</mosaic_0001>

<bundles_post_ra>
// kernel: tpu_custom_call.1
= control target key start
LH: loop header
LB: loop body
LE: loop exit
PB: predicated region body
PF: predicated region fallthrough
CT: control target
= control target key end

     0   :  { %10 = vsyncpa [#allocation4], 0  ;;  %s247_s0 = inlined_call_operand.vmem [shape: f32[32,128], index: 0, kind: input, shape index: {}]   ;;  %s248_s1 = inlined_call_operand.hbm [shape: f32[32,128], index: 1, kind: input, shape index: {}]   ;;  %s249_s2 = inlined_call_operand.vmem [shape: f32[32,1], index: 2, kind: input, shape index: {}]   ;;  %s250_s3 = inlined_call_operand.<no memory space> [shape: f32[1,1], index: 3, kind: input, shape index: {}]   ;;  %s251_s4 = inlined_call_operand.hbm [shape: f32[1,128], index: 4, kind: output, shape index: {}]  }
   0x1   :  { %11 = vsyncpa [#allocation5], 0  ;;  %s166_s15 = smov [#allocation3]   ;;  %s118_s19 = scalar_lea.hbm %s248_s1, 512 }
   0x2   :  { %s19_s16 = sshll.u32 %s166_s15, 4  ;;  %p119_p0 = scmp.ne.s32.totalorder %s248_s1, %s118_s19  ;;  %s20_s16 = int_to_ptr.vmem [resolvable:$true] %s19_s16 }
   0x3   :  { %p122_p1 = scmp.lt.u32.totalorder %s118_s19, %s248_s1 }
   0x5   :  { %p124_p2 = pnand %p122_p1, %p119_p0 }
   0x7   :  { %127 = shalt.err (!%p124_p2)
}
   0x8   :  { %s128_s24 = scalar_lea.vmem %s20_s16, 512  ;;  %p133_p4 = scmp.lt.s32.totalorder %s20_s16, %s20_s16 }
   0x9   :  { %p129_p3 = scmp.ne.s32.totalorder %s20_s16, %s128_s24  ;;  %p134_p5 = scmp.lt.s32.totalorder %s128_s24, %s128_s24 }
   0xb   :  { %p135_p6 = por %p134_p5, %p133_p4 }
   0xd   :  { %p136_p7 = pnand %p135_p6, %p129_p3 }
   0xf   :  { %139 = shalt.err (!%p136_p7)
}
  0x10   :  { %s167_s25 = smov 128   ;;  %s168_s26 = smov 8  }
  0x11   :  { %25 = dma.hbm_to_vmem [thread:$0]  %s248_s1, 512, %s20_s16, [#allocation4], %s167_s25, %s167_s25, %s168_s26  }
  0x12   :  { %162 = dma.done.wait [#allocation4], 512  }
  0x13   :  { %163 = vsyncadd [#allocation4], 4294966784  ;;  %v169_v0 = vmov 0   ;;  %v47_v1 = vld [vmem:[%s249_s2 + $0x10] sm:$0xff]  ;;  %v45_v2 = vld [vmem:[%s249_s2] sm:$0xff]  ;;  %v83_v33 = vstv %s250_s3 }
  0x14   :  { %113 = vset.pattern.permute.xlu1 %v169_v0  ;;  %112 = vset.pattern.permute.xlu0 %v169_v0  ;;  %v48_v3 = vld [vmem:[%s249_s2 + $0x18] sm:$0xff]  ;;  %v46_v4 = vld [vmem:[%s249_s2 + $0x8] sm:$0xff]  ;;  %v33_v5 = vld [vmem:[%s247_s0] sm:$0xff] }
  0x15   :  { %61 = vperm.xlu1 %113, %v47_v1   ;;  %51 = vperm.xlu0 %112, %v45_v2   ;;  %v37_v6 = vld [vmem:[#allocation3] sm:$0xff]  ;;  %v34_v7 = vld [vmem:[%s247_s0 + $0x8] sm:$0xff]  ;;  %v35_v10 = vld [vmem:[%s247_s0 + $0x10] sm:$0xff] }
  0x16   :  { %v38_v8 = vld [vmem:[#allocation3 + $0x8] sm:$0xff]  ;;  %v39_v11 = vld [vmem:[#allocation3 + $0x10] sm:$0xff]  ;;  %v41_v13 = vmul.f32 %v37_v6, %v33_v5  ;;  %v36_v15 = vld [vmem:[%s247_s0 + $0x18] sm:$0xff]  ;;  %s170_s0 = smov [#allocation6]  }
  0x17   :  { %v42_v14 = vmul.f32 %v38_v8, %v34_v7  ;;  %v40_v16 = vld [vmem:[#allocation3 + $0x18] sm:$0xff]  ;;  %v43_v17 = vmul.f32 %v39_v11, %v35_v10  ;;  %s98_s19 = sshll.u32 %s170_s0, 4  ;;  %s99_s19 = int_to_ptr.vmem [resolvable:$true] %s98_s19 }
  0x18   :  { %v44_v20 = vmul.f32 %v40_v16, %v36_v15  ;;  %s140_s20 = scalar_lea.vmem %s99_s19, 16  ;;  %s144_s21 = scalar_lea.vmem %s99_s19, 32 }
  0x19   :  { %66 = vperm.xlu1 %113, %v48_v3   ;;  %56 = vperm.xlu0 %112, %v46_v4   ;;  %p141_p8 = scmp.ne.s32.totalorder %s99_s19, %s140_s20  ;;  %p145_p9 = scmp.lt.s32.totalorder %s99_s19, %s99_s19 }
  0x1a   :  { %p146_p10 = scmp.lt.s32.totalorder %s144_s21, %s140_s20 }
  0x1c   :  { %p147_p11 = por %p146_p10, %p145_p9 }
  0x1e   :  { %p148_p12 = pnand %p147_p11, %p141_p8 }
  0x94   :  { %v62_v9 = vpop.permute.xlu1 %61  ;;  %v52_v12 = vpop.permute.xlu0 %51 }
  0x95   :  { %v69_v19 = vmul.f32 %v52_v12, %v41_v13  ;;  %v71_v23 = vmul.f32 %v62_v9, %v43_v17 }
  0x98   :  { %v57_v18 = vpop.permute.xlu0 %56  ;;  %v67_v22 = vpop.permute.xlu1 %66 }
  0x99   :  { %v70_v21 = vmul.f32 %v57_v18, %v42_v14  ;;  %v72_v25 = vmul.f32 %v67_v22, %v44_v20 }
  0x9b   :  { %v73_v24 = vadd.f32 %v70_v21, %v69_v19 }
  0x9d   :  { %v74_v26 = vadd.f32 %v73_v24, %v71_v23 }
  0x9f   :  { %v75_v27 = vadd.f32 %v74_v26, %v72_v25 }
  0xa1   :  { %v76_v28 = vrot.slane %v75_v27, 4 }
  0xa3   :  { %v77_v29 = vadd.f32 %v76_v28, %v75_v27 }
  0xa5   :  { %v78_v30 = vrot.slane %v77_v29, 2 }
  0xa7   :  { %v79_v31 = vadd.f32 %v78_v30, %v77_v29 }
  0xa9   :  { %v80_v32 = vrot.slane %v79_v31, 1 }
  0xab   :  { %v81_v34 = vadd.f32 %v80_v32, %v79_v31 }
  0xad   :  { %v84_v35 = vadd.f32 %v83_v33, %v81_v34 }
  0xaf   :  { %v85_v36 = vsub.f32 0.0, %v84_v35 }
  0xb1   :  { %v86_v37 = vmul.f32 1.442695, %v85_v36 }
  0xb3   :  { %114 = vpow2.f32 %v86_v37 }
  0xbd   :  { %v115_v38 = vpop.eup %114 }
  0xbe   :  { %v88_v39 = vadd.f32 1.0, %v115_v38 }
  0xc0   :  { %116 = vrcp.f32 %v88_v39 }
  0xca   :  { %v117_v40 = vpop.eup %116 }
  0xcb   :  { %91 = vst [vmem:[#allocation6] sm:$0x1] %v117_v40 }
  0xcc   :  { %151 = shalt.err (!%p148_p12)
}
  0xcd   :  { %s152_s23 = scalar_lea.hbm %s251_s4, 16 }
  0xce   :  { %p153_p13 = scmp.ne.s32.totalorder %s251_s4, %s152_s23  ;;  %p156_p0 = scmp.lt.u32.totalorder %s152_s23, %s251_s4 }
  0xd0   :  { %p158_p1 = pnand %p156_p0, %p153_p13 }
  0xd2   :  { %161 = shalt.err (!%p158_p1)
}
  0xd3   :  { %101 = dma.vmem_to_hbm [thread:$0]  %s99_s19, 16, %s251_s4, [#allocation5]  }
  0xd4   :  { %164 = dma.done.wait [#allocation5], 16  }
  0xd5   :  { %165 = vsyncadd [#allocation5], 4294967280 }
  0xd6   :  { %105 = vsyncpa [#allocation4], 1 }
  0xd7   :  { %106 = vsyncpa [#allocation5], 1 }

</bundles_post_ra>
